<compile_context>
chip_gen: v7x
topology: tpu7x:2x2x1
jax: 0.10.0
libtpu: 0.0.40
codegen_flags: <defaults>
</compile_context>

<pallas_src>
import functools

import jax
import jax.numpy as jnp
from jax.experimental import pallas as pl
from jax.experimental.pallas import tpu as pltpu


_LANES = 128
_SUBLANES = 8


def _vmem_budget():
    """Scoped-VMEM budget (bytes) derived from the actual chip generation."""
    cap = 0
    try:
        cap = int(getattr(pltpu.get_tpu_info(), "vmem_capacity_bytes", 0) or 0)
    except Exception:
        cap = 0
    if cap <= 0:
        cap = 64 * 1024 * 1024            # conservative default (v7x-sized VMEM)
    # Leave ~25% of physical VMEM for Mosaic scratch; cap at 96 MiB for v5e/v6e.
    return min((cap * 3) // 4, 96 * 1024 * 1024)


def _choose_batch_tile(B, C, T, itemsize, vmem_limit_bytes):
    """Batch tile size.  No divisibility constraints on B; tb may be 1."""
    # Live VMEM ~= 2x tile (double-buffered input) + a few f32 intermediates,
    # so keep the streamed tile at ~1/8 of the scoped budget.
    target_bytes = max(vmem_limit_bytes // 8, 256 * 1024)
    per_row = max(1, C * T * itemsize)
    tb = max(1, min(B, target_bytes // per_row))
    # v7x megacore: guarantee >= 2 grid steps on the "parallel" batch axis so
    # both TensorCores get work (harmless on single-TC v5e/v6e).
    if B >= 2:
        tb = min(tb, (B + 1) // 2)
    # Prefer an even number of tiles so the two v7x cores stay balanced.
    nt = -(-B // tb)
    if nt > 1 and nt % 2 == 1:
        tb_alt = -(-B // (nt + 1))
        if tb_alt >= 1 and (-(-B // tb_alt)) % 2 == 0:
            tb = tb_alt
    return tb


def _ce_transition_kernel(logits_ref, labels_ref, preds_ref, out_ref, *,
                          label_smoothing, batch_size, batch_tile, needs_mask):
    f32 = jnp.float32
    x = logits_ref[...]                      # (tb, C, T), native dtype, resident
    tb, C, T = x.shape
    labels = labels_ref[...]                 # (tb, 1, T) int32
    preds = preds_ref[...]                   # (tb, 1, T) int32

    if needs_mask:
        # Ragged tail tile: rows at global index >= B hold undefined data and
        # must not contribute to any partial sum.
        base = pl.program_id(0) * batch_tile
        row = jax.lax.broadcasted_iota(jnp.int32, (tb, 1), 0)
        valid = (base + row) < batch_size    # (tb, 1) bool
    else:
        valid = None

    def masked_sum(v):
        """Sum v, zeroing contributions from padded tail rows (axis 0)."""
        if needs_mask:
            m = valid.reshape((tb,) + (1,) * (v.ndim - 1))
            v = jnp.where(m, v, 0.0)
        return jnp.sum(v)

    # ---- fused label-smoothed CE partial sum --------------------------------
    #   loss[b,t] = lse[b,t] - sum_c q_c * x[b,c,t]
    #   q_c = (1-eps)*[c == label] + eps/C   (PyTorch label_smoothing target).
    # TODO(synk): an online-softmax fori_loop over C-chunks would cut this to a
    # single traversal of x; kept vectorized pending bundle-dump confirmation
    # that Mosaic keeps the per-chunk loads in vregs across the reductions.
    eps = float(label_smoothing)
    w_true = f32(1.0 - eps + eps / C)
    w_other = f32(eps / C)
    m = jnp.max(x, axis=1).astype(f32)                                   # (tb, T)
    sum_e = jnp.sum(jnp.exp(x.astype(f32) - m[:, None, :]), axis=1)      # (tb, T)
    lse = m + jnp.log(sum_e)
    cls = jax.lax.broadcasted_iota(jnp.int32, (1, C, 1), 1)              # (1, C, 1)
    tgt_dot = jnp.sum(jnp.where(cls == labels, w_true, w_other)
                      * x.astype(f32), axis=1)                           # (tb, T)
    ce_sum = masked_sum(lse - tgt_dot)

    # ---- temporal smoothness partial sum ------------------------------------
    if T >= 2:
        if T % _LANES == 0:
            # Lane-aligned: circular shift rides the XLU slot; subtracting the
            # wrap pair (= d[..., 0]) makes the result exact.
            d = pltpu.roll(x, 1, 2).astype(f32) - x.astype(f32)
            wrap = d[:, :, 0]
            d2_sum = masked_sum(d * d) - masked_sum(wrap * wrap)
        else:
            # TODO(synk): for large lane-misaligned T, pad T to a lane multiple
            # (+ column mask) so the roll path replaces these shifted slices.
            d = x[:, :, 1:].astype(f32) - x[:, :, :-1].astype(f32)
            d2_sum = masked_sum(d * d)
    else:
        d2_sum = f32(0.0)

    # ---- invalid transition count (preds is tiny: tb*T int32) ---------------
    if T >= 2:
        cur = preds[:, :, :T - 1]
        nxt = preds[:, :, 1:]
        invalid = (((cur == 0) & (nxt == 2)) |
                   ((cur == 2) & (nxt == 1)) |
                   ((cur == 1) & (nxt == 0)))
        inv_cnt = masked_sum(invalid.astype(f32))
    else:
        inv_cnt = f32(0.0)

    # ---- pack the three partials into lanes 0..2 of a dense (8, 128) block --
    rows = jax.lax.broadcasted_iota(jnp.int32, (1, _SUBLANES, _LANES), 1)
    cols = jax.lax.broadcasted_iota(jnp.int32, (1, _SUBLANES, _LANES), 2)
    packed = jnp.where((rows == 0) & (cols == 0), ce_sum,
             jnp.where((rows == 0) & (cols == 1), d2_sum,
             jnp.where((rows == 0) & (cols == 2), inv_cnt,
                       f32(0.0))))
    out_ref[...] = packed


def ce_transition_loss(logits, labels, preds, *,
                       smoothness_weight=0.1,
                       transition_penalty_weight=0.0,
                       label_smoothing=0.05):
    """logits: (B, C, T) f32/bf16, labels/preds: (B, T) int -> scalar loss."""
    B, C, T = logits.shape
    # Singleton middle axis => labels/preds blocks are (tb, 1, T): the (8, 128)
    # rule binds only the (1, T) == full trailing dims, so tb is unconstrained.
    labels3 = labels.astype(jnp.int32).reshape(B, 1, T)
    preds3 = preds.astype(jnp.int32).reshape(B, 1, T)

    vmem_limit = _vmem_budget()
    tb = _choose_batch_tile(B, C, T, logits.dtype.itemsize, vmem_limit)
    num_tiles = pl.cdiv(B, tb)
    needs_mask = (num_tiles * tb != B)

    kernel = functools.partial(_ce_transition_kernel,
                               label_smoothing=float(label_smoothing),
                               batch_size=B, batch_tile=tb,
                               needs_mask=needs_mask)
    partials = pl.pallas_call(
        kernel,
        grid=(num_tiles,),
        in_specs=[
            pl.BlockSpec((tb, C, T), lambda i: (i, 0, 0)),   # logits stream
            pl.BlockSpec((tb, 1, T), lambda i: (i, 0, 0)),   # labels
            pl.BlockSpec((tb, 1, T), lambda i: (i, 0, 0)),   # preds
        ],
        out_specs=pl.BlockSpec((1, _SUBLANES, _LANES), lambda i: (i, 0, 0)),
        out_shape=jax.ShapeDtypeStruct((num_tiles, _SUBLANES, _LANES),
                                       jnp.float32),
        compiler_params=pltpu.CompilerParams(
            dimension_semantics=("parallel",),
            vmem_limit_bytes=vmem_limit,
        ),
    )(logits, labels3, preds3)

    ce_sum = jnp.sum(partials[:, 0, 0])
    d2_sum = jnp.sum(partials[:, 0, 1])
    inv_cnt = jnp.sum(partials[:, 0, 2])

    ce = ce_sum / jnp.float32(B * T)
    smoothness = (jnp.float32(smoothness_weight) * d2_sum
                  / jnp.float32(B * C * max(T - 1, 1)))
    # The PyTorch module appends the value 1 for every invalid transition and
    # takes the mean, so the penalty is an indicator: weight iff any invalid.
    transition = jnp.float32(transition_penalty_weight) * jnp.where(
        inv_cnt > 0, jnp.float32(1.0), jnp.float32(0.0))
    return ce + smoothness + transition


def _reference_loss(logits, labels, preds, *,
                    smoothness_weight=0.1,
                    transition_penalty_weight=0.0,
                    label_smoothing=0.05):
    """Pure-JAX reference mirroring the PyTorch module."""
    B, C, T = logits.shape
    logits = logits.astype(jnp.float32)
    logp = jax.nn.log_softmax(logits, axis=1)
    onehot = jax.nn.one_hot(labels, C, axis=1, dtype=jnp.float32)
    nll = -jnp.sum(onehot * logp, axis=1)
    smooth_term = -jnp.mean(logp, axis=1)
    ce = jnp.mean((1.0 - label_smoothing) * nll + label_smoothing * smooth_term)
    d = logits[:, :, 1:] - logits[:, :, :-1]
    smoothness = smoothness_weight * jnp.mean(d * d)
    cur, nxt = preds[:, :-1], preds[:, 1:]
    invalid = (((cur == 0) & (nxt == 2)) | ((cur == 2) & (nxt == 1)) |
               ((cur == 1) & (nxt == 0)))
    transition = transition_penalty_weight * jnp.where(
        jnp.sum(invalid) > 0, 1.0, 0.0)
    return ce + smoothness + transition


if __name__ == "__main__":
    key = jax.random.PRNGKey(0)
    # (even split, slice path), (ragged tail -> masked), (lane-aligned roll path)
    shapes = ((2, 4, 16), (3, 4, 16), (2, 8, 128))
    for (B, C, T) in shapes:
        key, k1, k2, k3 = jax.random.split(key, 4)
        logits = jax.random.normal(k1, (B, C, T), dtype=jnp.float32)
        labels = jax.random.randint(k2, (B, T), 0, C, dtype=jnp.int32)
        preds = jax.random.randint(k3, (B, T), 0, 3, dtype=jnp.int32)
        for tw in (0.0, 0.5):
            loss = ce_transition_loss(logits, labels, preds,
                                      smoothness_weight=0.1,
                                      transition_penalty_weight=tw,
                                      label_smoothing=0.05)
            loss = jax.block_until_ready(loss)
            ref = _reference_loss(logits, labels, preds,
                                  smoothness_weight=0.1,
                                  transition_penalty_weight=tw,
                                  label_smoothing=0.05)
            assert jnp.allclose(loss, ref, atol=1e-5, rtol=1e-5), (
                (B, C, T), tw, float(loss), float(ref))
    print("KERNEL_OK")
</pallas_src>

<mosaic_0001>
module attributes {stable_mosaic.version = 11 : i64} {
  func.func @_ce_transition_kernel(%arg0: i32, %arg1: memref<1x4x16xf32, #tpu.memory_space<vmem>>, %arg2: memref<1x1x16xi32, #tpu.memory_space<vmem>>, %arg3: memref<1x1x16xi32, #tpu.memory_space<vmem>>, %arg4: memref<1x8x128xf32, #tpu.memory_space<vmem>>) attributes {dimension_semantics = [#tpu.dimension_semantics<parallel>], iteration_bounds = array<i64: 2>, scalar_prefetch = 0 : i64, scratch_operands = 0 : i64, tpu.core_type = #tpu.core_type<tc>, window_params = [{transform_indices = @transform_0, window_bounds = array<i64: 1, 4, 16>}, {transform_indices = @transform_1, window_bounds = array<i64: 1, 1, 16>}, {transform_indices = @transform_2, window_bounds = array<i64: 1, 1, 16>}, {transform_indices = @transform_3, window_bounds = array<i64: 1, 8, 128>}]} {
    %c0 = arith.constant 0 : index
    %c0_0 = arith.constant 0 : index
    %c0_1 = arith.constant 0 : index
    %0 = vector.load %arg1[%c0, %c0_0, %c0_1] : memref<1x4x16xf32, #tpu.memory_space<vmem>>, vector<1x4x16xf32>
    %c0_2 = arith.constant 0 : index
    %c0_3 = arith.constant 0 : index
    %c0_4 = arith.constant 0 : index
    %1 = vector.load %arg2[%c0_2, %c0_3, %c0_4] : memref<1x1x16xi32, #tpu.memory_space<vmem>>, vector<1x1x16xi32>
    %c0_5 = arith.constant 0 : index
    %c0_6 = arith.constant 0 : index
    %c0_7 = arith.constant 0 : index
    %2 = vector.load %arg3[%c0_5, %c0_6, %c0_7] : memref<1x1x16xi32, #tpu.memory_space<vmem>>, vector<1x1x16xi32>
    %cst = arith.constant dense<0xFF800000> : vector<1x16xf32>
    %3 = vector.multi_reduction <maximumf>, %0, %cst [1] : vector<1x4x16xf32> to vector<1x16xf32>
    %4 = vector.shape_cast %3 : vector<1x16xf32> to vector<1x1x16xf32>
    %5 = vector.broadcast %4 : vector<1x1x16xf32> to vector<1x4x16xf32>
    %6 = arith.subf %0, %5 : vector<1x4x16xf32>
    %7 = math.exp %6 : vector<1x4x16xf32>
    %cst_8 = arith.constant dense<0.000000e+00> : vector<1x16xf32>
    %8 = vector.multi_reduction <add>, %7, %cst_8 [1] : vector<1x4x16xf32> to vector<1x16xf32>
    %9 = math.log %8 : vector<1x16xf32>
    %10 = arith.addf %3, %9 : vector<1x16xf32>
    %11 = tpu.iota {dimensions = array<i32: 1>} : vector<1x4x1xi32>
    %12 = vector.broadcast %11 : vector<1x4x1xi32> to vector<1x4x16xi32>
    %13 = vector.broadcast %1 : vector<1x1x16xi32> to vector<1x4x16xi32>
    %14 = arith.cmpi eq, %12, %13 : vector<1x4x16xi32>
    %cst_9 = arith.constant 0.962499976 : f32
    %cst_10 = arith.constant 1.250000e-02 : f32
    %15 = vector.broadcast %cst_9 : f32 to vector<1x4x16xf32>
    %16 = vector.broadcast %cst_10 : f32 to vector<1x4x16xf32>
    %17 = arith.select %14, %15, %16 : vector<1x4x16xi1>, vector<1x4x16xf32>
    %18 = arith.mulf %17, %0 : vector<1x4x16xf32>
    %cst_11 = arith.constant dense<0.000000e+00> : vector<1x16xf32>
    %19 = vector.multi_reduction <add>, %18, %cst_11 [1] : vector<1x4x16xf32> to vector<1x16xf32>
    %20 = arith.subf %10, %19 : vector<1x16xf32>
    %21 = vector.shape_cast %20 : vector<1x16xf32> to vector<1x1x16xf32>
    %cst_12 = arith.constant dense<0.000000e+00> : vector<1xf32>
    %22 = vector.multi_reduction <add>, %21, %cst_12 [1, 2] : vector<1x1x16xf32> to vector<1xf32>
    %23 = vector.shape_cast %22 : vector<1xf32> to vector<1x1x1xf32>
    %24 = vector.extract %23[0, 0, 0] : f32 from vector<1x1x1xf32>
    %25 = vector.extract_strided_slice %0 {offsets = [0, 0, 1], sizes = [1, 4, 15], strides = [1, 1, 1]} : vector<1x4x16xf32> to vector<1x4x15xf32>
    %26 = vector.extract_strided_slice %0 {offsets = [0, 0, 0], sizes = [1, 4, 15], strides = [1, 1, 1]} : vector<1x4x16xf32> to vector<1x4x15xf32>
    %27 = arith.subf %25, %26 : vector<1x4x15xf32>
    %28 = arith.mulf %27, %27 : vector<1x4x15xf32>
    %29 = vector.shape_cast %28 : vector<1x4x15xf32> to vector<1x1x4x15xf32>
    %cst_13 = arith.constant dense<0.000000e+00> : vector<1xf32>
    %30 = vector.multi_reduction <add>, %29, %cst_13 [1, 2, 3] : vector<1x1x4x15xf32> to vector<1xf32>
    %31 = vector.shape_cast %30 : vector<1xf32> to vector<1x1x1x1xf32>
    %32 = vector.extract %31[0, 0, 0, 0] : f32 from vector<1x1x1x1xf32>
    %33 = vector.extract_strided_slice %2 {offsets = [0, 0, 0], sizes = [1, 1, 15], strides = [1, 1, 1]} : vector<1x1x16xi32> to vector<1x1x15xi32>
    %34 = vector.extract_strided_slice %2 {offsets = [0, 0, 1], sizes = [1, 1, 15], strides = [1, 1, 1]} : vector<1x1x16xi32> to vector<1x1x15xi32>
    %c0_i32 = arith.constant 0 : i32
    %35 = vector.broadcast %c0_i32 : i32 to vector<1x1x15xi32>
    %36 = arith.cmpi eq, %33, %35 : vector<1x1x15xi32>
    %c2_i32 = arith.constant 2 : i32
    %37 = vector.broadcast %c2_i32 : i32 to vector<1x1x15xi32>
    %38 = arith.cmpi eq, %34, %37 : vector<1x1x15xi32>
    %39 = arith.andi %36, %38 : vector<1x1x15xi1>
    %c2_i32_14 = arith.constant 2 : i32
    %40 = vector.broadcast %c2_i32_14 : i32 to vector<1x1x15xi32>
    %41 = arith.cmpi eq, %33, %40 : vector<1x1x15xi32>
    %c1_i32 = arith.constant 1 : i32
    %42 = vector.broadcast %c1_i32 : i32 to vector<1x1x15xi32>
    %43 = arith.cmpi eq, %34, %42 : vector<1x1x15xi32>
    %44 = arith.andi %41, %43 : vector<1x1x15xi1>
    %45 = arith.ori %39, %44 : vector<1x1x15xi1>
    %c1_i32_15 = arith.constant 1 : i32
    %46 = vector.broadcast %c1_i32_15 : i32 to vector<1x1x15xi32>
    %47 = arith.cmpi eq, %33, %46 : vector<1x1x15xi32>
    %c0_i32_16 = arith.constant 0 : i32
    %48 = vector.broadcast %c0_i32_16 : i32 to vector<1x1x15xi32>
    %49 = arith.cmpi eq, %34, %48 : vector<1x1x15xi32>
    %50 = arith.andi %47, %49 : vector<1x1x15xi1>
    %51 = arith.ori %45, %50 : vector<1x1x15xi1>
    %52 = arith.extui %51 : vector<1x1x15xi1> to vector<1x1x15xi32>
    %53 = arith.sitofp %52 : vector<1x1x15xi32> to vector<1x1x15xf32>
    %54 = vector.shape_cast %53 : vector<1x1x15xf32> to vector<1x1x1x15xf32>
    %cst_17 = arith.constant dense<0.000000e+00> : vector<1xf32>
    %55 = vector.multi_reduction <add>, %54, %cst_17 [1, 2, 3] : vector<1x1x1x15xf32> to vector<1xf32>
    %56 = vector.shape_cast %55 : vector<1xf32> to vector<1x1x1x1xf32>
    %57 = vector.extract %56[0, 0, 0, 0] : f32 from vector<1x1x1x1xf32>
    %58 = tpu.iota {dimensions = array<i32: 1>} : vector<1x8x128xi32>
    %59 = tpu.iota {dimensions = array<i32: 2>} : vector<1x8x128xi32>
    %c0_i32_18 = arith.constant 0 : i32
    %60 = vector.broadcast %c0_i32_18 : i32 to vector<1x8x128xi32>
    %61 = arith.cmpi eq, %58, %60 : vector<1x8x128xi32>
    %c0_i32_19 = arith.constant 0 : i32
    %62 = vector.broadcast %c0_i32_19 : i32 to vector<1x8x128xi32>
    %63 = arith.cmpi eq, %59, %62 : vector<1x8x128xi32>
    %64 = arith.andi %61, %63 : vector<1x8x128xi1>
    %c0_i32_20 = arith.constant 0 : i32
    %65 = vector.broadcast %c0_i32_20 : i32 to vector<1x8x128xi32>
    %66 = arith.cmpi eq, %58, %65 : vector<1x8x128xi32>
    %c1_i32_21 = arith.constant 1 : i32
    %67 = vector.broadcast %c1_i32_21 : i32 to vector<1x8x128xi32>
    %68 = arith.cmpi eq, %59, %67 : vector<1x8x128xi32>
    %69 = arith.andi %66, %68 : vector<1x8x128xi1>
    %c0_i32_22 = arith.constant 0 : i32
    %70 = vector.broadcast %c0_i32_22 : i32 to vector<1x8x128xi32>
    %71 = arith.cmpi eq, %58, %70 : vector<1x8x128xi32>
    %c2_i32_23 = arith.constant 2 : i32
    %72 = vector.broadcast %c2_i32_23 : i32 to vector<1x8x128xi32>
    %73 = arith.cmpi eq, %59, %72 : vector<1x8x128xi32>
    %74 = arith.andi %71, %73 : vector<1x8x128xi1>
    %cst_24 = arith.constant 0.000000e+00 : f32
    %75 = vector.broadcast %57 : f32 to vector<1x8x128xf32>
    %76 = vector.broadcast %cst_24 : f32 to vector<1x8x128xf32>
    %77 = arith.select %74, %75, %76 : vector<1x8x128xi1>, vector<1x8x128xf32>
    %78 = vector.broadcast %32 : f32 to vector<1x8x128xf32>
    %79 = arith.select %69, %78, %77 : vector<1x8x128xi1>, vector<1x8x128xf32>
    %80 = vector.broadcast %24 : f32 to vector<1x8x128xf32>
    %81 = arith.select %64, %80, %79 : vector<1x8x128xi1>, vector<1x8x128xf32>
    %c0_25 = arith.constant 0 : index
    %c0_26 = arith.constant 0 : index
    %c0_27 = arith.constant 0 : index
    %82 = vector.load %arg4[%c0_25, %c0_26, %c0_27] : memref<1x8x128xf32, #tpu.memory_space<vmem>>, vector<1x8x128xf32>
    tpu.vector_store %arg4[%c0_25, %c0_26, %c0_27], %81 {strides = array<i32>} : memref<1x8x128xf32, #tpu.memory_space<vmem>>, vector<1x8x128xf32>,
    return
  }
  func.func @transform_0(%arg0: i32) -> (i32, i32, i32) {
    %c0_i32 = arith.constant 0 : i32
    %c0_i32_0 = arith.constant 0 : i32
    %c0_i32_1 = arith.constant 0 : i32
    return %arg0, %c0_i32, %c0_i32_0 : i32, i32, i32
  }
  func.func @transform_1(%arg0: i32) -> (i32, i32, i32) {
    %c0_i32 = arith.constant 0 : i32
    %c0_i32_0 = arith.constant 0 : i32
    %c0_i32_1 = arith.constant 0 : i32
    return %arg0, %c0_i32, %c0_i32_0 : i32, i32, i32
  }
  func.func @transform_2(%arg0: i32) -> (i32, i32, i32) {
    %c0_i32 = arith.constant 0 : i32
    %c0_i32_0 = arith.constant 0 : i32
    %c0_i32_1 = arith.constant 0 : i32
    return %arg0, %c0_i32, %c0_i32_0 : i32, i32, i32
  }
  func.func @transform_3(%arg0: i32) -> (i32, i32, i32) {
    %c0_i32 = arith.constant 0 : i32
    %c0_i32_0 = arith.constant 0 : i32
    %c0_i32_1 = arith.constant 0 : i32
    return %arg0, %c0_i32, %c0_i32_0 : i32, i32, i32
  }
}

</mosaic_0001>

<bundles_post_ra>
// kernel: tpu_custom_call.1
= control target key start
LH: loop header
LB: loop body
LE: loop exit
PB: predicated region body
PF: predicated region fallthrough
CT: control target
= control target key end

     0   :  { %8 = vsyncpa [#allocation3], 0  ;;  %s842_s0 = inlined_call_operand.hbm [shape: f32[2,4,16], index: 0, kind: input, shape index: {}]   ;;  %s843_s1 = inlined_call_operand.vmem [shape: s32[2,1,16], index: 1, kind: input, shape index: {}]   ;;  %s844_s2 = inlined_call_operand.vmem [shape: s32[2,1,16], index: 2, kind: input, shape index: {}]   ;;  %s845_s3 = inlined_call_operand.hbm [shape: f32[2,8,128], index: 3, kind: output, shape index: {}]  }
   0x1   :  { %10 = vsyncpa [#allocation3 + $0x1], 0 }
   0x2   :  { %11 = vsyncpa [#allocation4], 0 }
   0x3   :  { %13 = vsyncpa [#allocation4 + $0x1], 0  ;;  %s638_s12 = smov 0   ;;  %s640_s13 = smov 0  }
   0x4   :  { %s642_s14 = smov 0   ;;  %s644_s15 = smov 0  }
   0x5 LB: > { %s659_s16 = sadd.s32 4294967295, %s609_s15   ;;  %s438_s17 = sadd.s32 4294967294, %s609_s15   ;;  %s609_s15 = sphi %s644_s15, %s860_s15   ;;  %s605_s14 = sphi %s642_s14, %s859_s14   ;;  %s601_s13 = sphi %s640_s13, %s858_s13   ;;  %s597_s12 = sphi %s638_s12, %s857_s12  }
   0x6   : > { %s663_s18 = sadd.s32 1, %s609_s15   ;;  %s26_s19 = sadd.s32 1, %s605_s14 }
   0x7   : > { %s23_s20 = ssub.s32 %s609_s15, %s663_s18  ;;  %p33_p0 = scmp.ne.s32.totalorder %s605_s14, %s601_s13 }
   0x8   : > { %p24_p1 = scmp.eq.s32.totalorder %s23_s20, 0  ;;  %p34_p2 = scmp.eq.s32.totalorder %s609_s15, 0 }
   0x9   : > { %p39_p3 = scmp.ne.s32.totalorder %s601_s13, %s597_s12  ;;  %p40_p4 = scmp.eq.s32.totalorder %s659_s16, 0 }
   0xa   : > { %s675_s21 = scalar_select %p24_p1, %s605_s14, %s26_s19  }
   0xb   : > { %p677_p5 = por %p34_p2, %p33_p0  ;;  %p681_p6 = por %p40_p4, %p39_p3 }
   0xc   : > { %p115_p7 = scmp.eq.s32.totalorder %s659_s16, 1  ;;  %p121_p8 = scmp.eq.s32.totalorder %s438_s17, 1 }
   0xd   : > { %p470_p10 = scmp.lt.s32.totalorder %s609_s15, 2  ;;  %s141_s26 = sand.u32 1, %s605_s14  }
   0xe   : > { %p688_p11 = por %p115_p7, %p33_p0  ;;  %p692_p12 = por %p121_p8, %p39_p3 }
   0xf   : > { %s442_s27 = sshll.u32 %s609_s15, 6  ;;  %s441_s28 = sshll.u32 %s141_s26, 2 }
  0x10   : > { %s849_s24 = scalar_select %p688_p11, 1, 0 }
  0x11   : > { %s850_s25 = scalar_select %p692_p12, 1, 0 }
  0x12   : > { %s701_s4 = scalar_lea.hbm %s842_s0, %s442_s27  ;;  %s145_s5 = scalar_lea.vmem [#allocation2], %s441_s28 }
  0x13   : > { %s152_s6 = sshll.u32 %s145_s5, 4  ;;  %p705_p13 = pnand %p470_p10, %p677_p5  ;;  %s709_s6 = int_to_ptr.vmem [resolvable:$true] %s152_s6 }
  0x14   : > { %s142_s8 = scalar_lea.sflag [#allocation3], %s141_s26  ;;  %s513_s9 = scalar_lea.hbm %s701_s4, 64 }
  0x15   : > { %p514_p2 = scmp.ne.s32.totalorder %s701_s4, %s513_s9  ;;  %p515_p3 = pneg %p705_p13 }
  0x16   : > { %s518_s17 = scalar_lea.hbm %s842_s0, 128  ;;  %p519_p5 = scmp.lt.u32.totalorder %s701_s4, %s842_s0 }
  0x17   : > { %p516_p4 = pnand %p515_p3, %p514_p2  ;;  %p520_p8 = scmp.lt.u32.totalorder %s518_s17, %s513_s9 }
  0x18   : > { %p522_p9 = scmp.lt.u32.totalorder %s513_s9, %s701_s4 }
  0x19   : > { %p517_p7 = pneg %p516_p4  ;;  %p521_p10 = por %p520_p8, %p519_p5 }
  0x1b   : > { %p523_p0 = por %p522_p9, %p521_p10 }
  0x1d   : > { %p524_p1 = pnand %p523_p0, %p517_p7 }
  0x1f   : > { %527 = shalt.err (!%p524_p1)
}
  0x20   : > { %s528_s22 = scalar_lea.vmem %s709_s6, 64  ;;  %s611_s26 = smov [#allocation2]  }
  0x21   : > { %p529_p2 = scmp.ne.s32.totalorder %s709_s6, %s528_s22  ;;  %s533_s27 = sshll.u32 %s611_s26, 4  ;;  %s534_s27 = int_to_ptr.vmem [resolvable:$false] %s533_s27 }
  0x22   : > { %s535_s28 = scalar_lea.vmem %s534_s27, 128  ;;  %p536_p11 = scmp.lt.s32.totalorder %s709_s6, %s534_s27 }
  0x23   : > { %p531_p4 = pnand %p529_p2, %p515_p3  ;;  %p537_p5 = scmp.lt.s32.totalorder %s535_s28, %s528_s22 }
  0x25   : > { %p532_p12 = pneg %p531_p4  ;;  %p538_p8 = por %p537_p5, %p536_p11 }
  0x27   : > { %p539_p9 = pnand %p538_p8, %p532_p12 }
  0x29   : > { %542 = shalt.err (!%p539_p9)
}
  0x2a   : > { %465 = dma.hbm_to_vmem [thread:$0]  (!%p705_p13), %s701_s4, 64, %s709_s6, %s142_s8  }
  0x2b   : > { %p852_p0 = scmp.lt.s32.totalorder %s609_s15, 3  ;;  %p853_p1 = scmp.ge.s32.totalorder %s609_s15, 1 }
  0x2d   : > { %p170_p3 = pnand %p853_p1, %p852_p0 }
  0x2e   : > { %s743_s29 = sand.u32 (!%p170_p3), 1, %s601_s13  }
  0x2f   : > { %173 = sbr.rel (%p170_p3) target bundleno = 517 (0x205), region = 32  ;;  %s444_s30 = sshll.u32 (!%p170_p3), %s743_s29, 2 }
  0x30   : > { %s176_s5 = scalar_lea.sflag (!%p170_p3), [#allocation3], %s743_s29  ;;  %s179_s9 = scalar_lea.vmem (!%p170_p3), [#allocation2], %s444_s30 }
  0x36   : > { %588 = dma.done.wait (%p681_p6), %s176_s5, 64  }
  0x37   : > { %590 = vsyncadd (%p681_p6), %s176_s5, 4294967232  ;;  %p208_p11 = scmp.lt.s32.totalorder %s659_s16, 1  ;;  %v214_v0 = vld [vmem:[%s179_s9] sm:$0xf]  ;;  %s612_s10 = smov 1   ;;  %v613_v2 = vmov 0   ;;  %v238_v16 = vlaneseq }
  0x38   : > { %267 = vrot.lane.b32.xlu0 %v214_v0, %s612_s10  ;;  %s614_s23 = smov 127   ;;  %vm217_vm3 = vcmask 125952   ;;  %v615_v25 = vmov 0.0125   ;;  %vm255_vm5 = vcmask 122880   ;;  %vm276_vm13 = vcmask 117760  }
  0x39   : > { %s753_s4 = scalar_select %p208_p11, %s659_s16, 1  ;;  %v218_v6 = vsel %vm217_vm3, %v214_v0, -inf  ;;  %v780_v19 = vshrl.u32 %v238_v16, 7  ;;  %v616_v49 = vmov 0.0   ;;  %vm309_vm15 = vcmask 114688  }
  0x3a   : > { %v219_v7 = vrot.slane %v218_v6, 4  ;;  %s445_s20 = sshll.u32 %s743_s29, 3  ;;  %s449_s27 = sshll.u32 %s659_s16, 7 }
  0x3b   : > { %s213_s8 = scalar_lea.vmem %s844_s2, %s753_s4  ;;  %s210_s19 = scalar_lea.vmem %s843_s1, %s753_s4 }
  0x3c   : > { %v759_v1 = vld [vmem:[%s213_s8] sm:$0x1]  ;;  %v220_v8 = vmax.f32 %v218_v6, %v219_v7  ;;  %s207_s30 = scalar_lea.vmem [#allocation5], %s445_s20  ;;  %s798_s6 = scalar_lea.hbm %s845_s3, %s449_s27 }
  0x3d   : > { %vm294_vm0 = vcmp.eq.s32.totalorder %v759_v1, 1  ;;  %vm288_vm1 = vcmp.eq.s32.totalorder %v759_v1, 2  ;;  %vm287_vm2 = vcmp.eq.s32.totalorder %v759_v1, 0  ;;  %v446_v21 = vld [vmem:[%s210_s19] ss:$0 sm:$0xff]  ;;  %s350_s5 = sshll.u32 %s207_s30, 4  ;;  %s800_s5 = int_to_ptr.vmem [resolvable:$true] %s350_s5 }
  0x3e   : > { %v295_v3 = vsel %vm294_vm0, 1, %v613_v2  ;;  %v289_v4 = vsel %vm288_vm1, 1, %v613_v2  ;;  %v301_v5 = vsel %vm287_vm2, 1, %v613_v2  ;;  %v221_v9 = vrot.slane %v220_v8, 2  ;;  %s337_s16 = scalar_lea.sflag [#allocation4], %s743_s29  ;;  %s543_s7 = scalar_lea.vmem %s800_s5, 128 }
  0x3f   : > { %296 = vrot.lane.b32.xlu1 %v295_v3, %s614_s23  ;;  %290 = vrot.lane.b32.xlu0 %v289_v4, %s614_s23  ;;  %vm244_vm4 = vcmp.eq.s32.totalorder %v780_v19, %v446_v21  ;;  %p544_p6 = scmp.ne.s32.totalorder %s800_s5, %s543_s7  ;;  %p854_p12 = scmp.ne.s32.totalorder %s849_s24, 0 }
  0x40   : > { %v222_v10 = vmax.f32 %v220_v8, %v221_v9  ;;  %v245_v26 = vsel %vm244_vm4, 0.9625, %v615_v25  ;;  %v321_v9 = vand.u32 127, %v238_v16  ;;  %s617_s8 = smov [#allocation5]  }
  0x41   : > { %v246_v28 = vmul.f32 %v245_v26, %v214_v0  ;;  %p545_p13 = pnand %p544_p6, %p854_p12  ;;  %s547_s10 = sshll.u32 %s617_s8, 4  ;;  %s548_s10 = int_to_ptr.vmem [resolvable:$false] %s547_s10 }
  0x42   : > { %v223_v11 = vrot.slane %v222_v10, 1  ;;  %p550_p10 = scmp.lt.s32.totalorder %s800_s5, %s548_s10 }
  0x43   : > { %302 = vrot.lane.b32.xlu1 %v301_v5, %s614_s23  ;;  %v247_v29 = vsel %vm217_vm3, %v246_v28, 0.0  ;;  %p546_p7 = pneg %p545_p13 }
  0x44   : > { %v224_v12 = vmax.f32 %v222_v10, %v223_v11  ;;  %v248_v30 = vrot.slane %v247_v29, 4 }
  0x46   : > { %v225_v13 = vsub.f32 %v214_v0, %v224_v12  ;;  %v249_v31 = vadd.f32 %v248_v30, %v247_v29 }
  0x48   : > { %v226_v14 = vmul.f32 1.442695, %v225_v13  ;;  %v250_v32 = vrot.slane %v249_v31, 2 }
  0x4a   : > { %509 = vpow2.f32 %v226_v14  ;;  %v251_v33 = vadd.f32 %v250_v32, %v249_v31 }
  0x4c   : > { %v252_v36 = vrot.slane %v251_v33, 1 }
  0x4e   : > { %v253_v38 = vadd.f32 %v252_v36, %v251_v33 }
  0x54   : > { %v510_v15 = vpop.eup %509 }
  0x55   : > { %v228_v17 = vsel %vm217_vm3, %v510_v15, 0.0  ;;  %vm323_vm3 = vcmp.eq.s32.totalorder %v321_v9, 0 }
  0x56   : > { %v229_v18 = vrot.slane %v228_v17, 4 }
  0x58   : > { %v230_v20 = vadd.f32 %v229_v18, %v228_v17 }
  0x5a   : > { %v231_v22 = vrot.slane %v230_v20, 2 }
  0x5c   : > { %v232_v23 = vadd.f32 %v231_v22, %v230_v20 }
  0x5e   : > { %v233_v24 = vrot.slane %v232_v23, 1 }
  0x60   : > { %v234_v27 = vadd.f32 %v233_v24, %v232_v23 }
  0x62   : > { %511 = vlog2.f32 %v234_v27 }
  0x6c   : > { %v512_v34 = vpop.eup %511 }
  0x6d   : > { %v236_v35 = vmul.f32 0.6931472, %v512_v34 }
  0x6f   : > { %v237_v37 = vadd.f32 %v236_v35, %v224_v12 }
  0x71   : > { %v254_v39 = vsub.f32 %v237_v37, %v253_v38 }
  0x73   : > { %v256_v40 = vsel %vm255_vm5, %v254_v39, 0.0 }
  0x74   : > { %257 = vadd.xlane.f32.xlu1 %v256_v40 }
  0xaa   : > { %v268_v41 = vpop.permute.xlu0 %267 }
  0xab   : > { %v270_v42 = vsub.f32 %v214_v0, %v268_v41 }
  0xad   : > { %v271_v43 = vmul.f32 %v270_v42, %v270_v42 }
  0xaf   : > { %273 = vrot.lane.b32.xlu0 %v271_v43, %s614_s23  ;;  %s549_s23 = scalar_lea.vmem %s548_s10, 256 }
  0xb0   : > { %p551_p2 = scmp.lt.s32.totalorder %s549_s23, %s543_s7 }
  0xb1   : > { %v297_v44 = vpop.permute.xlu1 %296  ;;  %v291_v45 = vpop.permute.xlu0 %290 }
  0xb2   : > { %vm298_vm6 = vcmp.ne.s32.totalorder %v297_v44, 0  ;;  %vm292_vm7 = vcmp.ne.s32.totalorder %v291_v45, 0  ;;  %p552_p4 = por %p551_p2, %p550_p10 }
  0xb3   : > { %vm299_vm8 = vmand %vm288_vm1, %vm298_vm6  ;;  %vm327_vm1 = vcmp.eq.s32.totalorder %v321_v9, 2 }
  0xb4   : > { %vm293_vm9 = vmand %vm287_vm2, %vm292_vm7  ;;  %vm325_vm2 = vcmp.eq.s32.totalorder %v321_v9, 1  ;;  %p553_p5 = pnand %p552_p4, %p546_p7 }
  0xb5   : > { %v303_v46 = vpop.permute.xlu1 %302  ;;  %vm300_vm11 = vmor %vm293_vm9, %vm299_vm8 }
  0xb6   : > { %vm304_vm10 = vcmp.ne.s32.totalorder %v303_v46, 0 }
  0xb7   : > { %vm305_vm12 = vmand %vm294_vm0, %vm304_vm10  ;;  %vm322_vm0 = vcmp.eq.s32.totalorder %v780_v19, 0 }
  0xb8   : > { %vm306_vm14 = vmor %vm300_vm11, %vm305_vm12 }
  0xb9   : > { %v447_v50 = vsel %vm306_vm14, 1.0, %v616_v49  ;;  %vm328_vm4 = vmand %vm322_vm0, %vm327_vm1 }
  0xba   : > { %v310_v51 = vsel %vm309_vm15, %v447_v50, 0.0  ;;  %vm326_vm5 = vmand %vm322_vm0, %vm325_vm2 }
  0xbb   : > { %vm324_vm6 = vmand %vm322_vm0, %vm323_vm3 }
 0x101   : > { %v258_v52 = vpop.xlane.xlu1 %257 }
 0x102   : > { %v259_v53 = vrot.slane %v258_v52, 4 }
 0x104   : > { %v260_v54 = vadd.f32 %v259_v53, %v258_v52 }
 0x106   : > { %v261_v55 = vrot.slane %v260_v54, 2 }
 0x108   : > { %v262_v56 = vadd.f32 %v261_v55, %v260_v54 }
 0x10a   : > { %v263_v57 = vrot.slane %v262_v56, 1 }
 0x10c   : > { %v264_v58 = vadd.f32 %v263_v57, %v262_v56 }
 0x10e   : > { %452 = vpush %v264_v58 }
 0x121   : > { %v274_v47 = vpop.permute.xlu0 %273 }
 0x122   : > { %v277_v48 = vsel %vm276_vm13, %v274_v47, 0.0 }
 0x123   : > { %278 = vadd.xlane.f32.xlu0 %v277_v48 }
 0x127   : > { %311 = vadd.xlane.f32.xlu0 %v310_v51 }
 0x13f   : > { %s453_s22 = spop %452 }
 0x140   : > { %v333_v13 = vstv %s453_s22 }
 0x1b0   : > { %v279_v59 = vpop.xlane.xlu0 %278 }
 0x1b1   : > { %v280_v60 = vrot.slane %v279_v59, 4 }
 0x1b3   : > { %v281_v61 = vadd.f32 %v280_v60, %v279_v59 }
 0x1b4   : > { %v312_v62 = vpop.xlane.xlu0 %311 }
 0x1b5   : > { %v282_v63 = vrot.slane %v281_v61, 2  ;;  %v313_v0 = vrot.slane %v312_v62, 4 }
 0x1b7   : > { %v314_v1 = vadd.f32 %v313_v0, %v312_v62  ;;  %v283_v2 = vadd.f32 %v282_v63, %v281_v61 }
 0x1b9   : > { %v315_v3 = vrot.slane %v314_v1, 2  ;;  %v284_v4 = vrot.slane %v283_v2, 1 }
 0x1bb   : > { %v316_v5 = vadd.f32 %v315_v3, %v314_v1  ;;  %v285_v6 = vadd.f32 %v284_v4, %v283_v2 }
 0x1bd   : > { %454 = vpush %v285_v6  ;;  %v317_v7 = vrot.slane %v316_v5, 1 }
 0x1bf   : > { %v318_v8 = vadd.f32 %v317_v7, %v316_v5 }
 0x1c1   : > { %456 = vpush %v318_v8 }
 0x1ee   : > { %s455_s26 = spop %454 }
 0x1ef   : > { %v331_v11 = vstv %s455_s26 }
 0x1f2   : > { %s457_s28 = spop %456 }
 0x1f3   : > { %v329_v10 = vstv %s457_s28 }
 0x1f4   : > { %v330_v12 = vsel %vm328_vm4, %v329_v10, 0.0 }
 0x1f5   : > { %v332_v14 = vsel %vm326_vm5, %v331_v11, %v330_v12 }
 0x1f6   : > { %v334_v15 = vsel %vm324_vm6, %v333_v13, %v332_v14 }
 0x1f7   : > { %335 = vst [vmem:[%s207_s30] sm:$0xff] %v334_v15 }
 0x1f8   : > { %556 = shalt.err (!%p553_p5)
}
 0x1f9   : > { %s557_s29 = scalar_lea.hbm %s798_s6, 128  ;;  %s561_s19 = scalar_lea.hbm %s845_s3, 256 }
 0x1fa   : > { %p558_p8 = scmp.ne.s32.totalorder %s798_s6, %s557_s29  ;;  %p562_p1 = scmp.lt.u32.totalorder %s798_s6, %s845_s3 }
 0x1fb   : > { %p563_p3 = scmp.lt.u32.totalorder %s561_s19, %s557_s29  ;;  %p565_p6 = scmp.lt.u32.totalorder %s557_s29, %s798_s6 }
 0x1fc   : > { %p559_p9 = pnand %p558_p8, %p854_p12 }
 0x1fd   : > { %p564_p11 = por %p563_p3, %p562_p1 }
 0x1fe   : > { %p560_p0 = pneg %p559_p9 }
 0x1ff   : > { %p566_p13 = por %p565_p6, %p564_p11 }
 0x201   : > { %p567_p7 = pnand %p566_p13, %p560_p0 }
 0x203   : > { %570 = shalt.err (!%p567_p7)
}
 0x204   : > { %460 = dma.vmem_to_hbm [thread:$0]  (%p854_p12), %s800_s5, 128, %s798_s6, %s337_s16  }
 0x205 PF: > { %s362_s26 = sand.u32 1, %s597_s12   ;;  %p855_p10 = scmp.ne.s32.totalorder %s850_s25, 0 }
 0x206   : > { %p856_p2 = scmp.ge.s32.totalorder %s609_s15, 2  ;;  %s363_s27 = scalar_lea.sflag [#allocation4], %s362_s26 }
 0x208   : > { %p467_p4 = pnand %p856_p2, %p855_p10 }
 0x20a   : > { %592 = dma.done.wait (!%p467_p4), %s363_s27, 128  }
 0x20b   : > { %594 = vsyncadd (!%p467_p4), %s363_s27, 4294967168  ;;  %p16_p5 = scmp.ge.s32.totalorder %s663_s18, 4   ;;  %s857_s12 = smov %s601_s13 }
 0x20c   : > { %s858_s13 = smov %s605_s14  ;;  %s859_s14 = smov %s675_s21 }
 0x20d   : > { %s860_s15 = smov %s663_s18  ;;  %18 = sbr.rel (!%p16_p5) target bundleno = 5 (0x5), region = 83 }
 0x214   :  { %368 = vsyncpa [#allocation3], 1 }
 0x215   :  { %370 = vsyncpa [#allocation3 + $0x1], 1 }
 0x216   :  { %371 = vsyncpa [#allocation4], 1 }
 0x217   :  { %373 = vsyncpa [#allocation4 + $0x1], 1 }

</bundles_post_ra>
